<compile_context>
chip_gen: v6e
topology: v6e:2x2x1
jax: 0.10.0
libtpu: 0.0.40
codegen_flags: <defaults>
</compile_context>

<pallas_src>
import jax
import jax.numpy as jnp
from jax.experimental import pallas as pl
from jax.experimental.pallas import tpu as pltpu


def _normalize_kernel(sb_ref, x_ref, o_ref):
    # sb_ref : VMEM (row_tile, 2) f32, column 0 = scale (1/sd), column 1 = bias (-mean/sd)
    # x_ref  : VMEM (row_tile, hw_tile) input tile
    # o_ref  : VMEM (row_tile, hw_tile) output tile
    sb = sb_ref[...]
    scale = sb[:, 0:1]                      # (row_tile, 1) -> lane broadcast
    bias = sb[:, 1:2]
    x = x_ref[...].astype(jnp.float32)
    o_ref[...] = (x * scale + bias).astype(o_ref.dtype)


def _cdiv(a: int, b: int) -> int:
    return -(-a // b)


def _round_up(a: int, m: int) -> int:
    return _cdiv(a, m) * m


def _round_down(a: int, m: int) -> int:
    return (a // m) * m


def normalize_layer(x: jax.Array, means: jax.Array, sds: jax.Array) -> jax.Array:
    """(x - means[c]) / sds[c] for NCHW x."""
    n, c, h, w = x.shape
    assert means.shape == (c,) and sds.shape == (c,)

    rows = n * c
    hw = h * w

    # Per-row affine params, packed into one (rows, 2) f32 array.
    inv_sds = 1.0 / sds.astype(jnp.float32)                       # (C,)
    scale_rows = jnp.tile(inv_sds, n)                             # (N*C,)
    bias_rows = jnp.tile(-means.astype(jnp.float32) * inv_sds, n) # (N*C,)
    sb = jnp.stack([scale_rows, bias_rows], axis=1)               # (N*C, 2)

    x2 = x.reshape(rows, hw)                                      # free (contiguous)
    itemsize = x.dtype.itemsize

    # ---- tile selection -------------------------------------------------
    try:
        kind = jax.devices()[0].device_kind.lower()
    except Exception:  # pragma: no cover - defensive, keeps the conservative path
        kind = ""
    # Double-buffered x + out ~= 4x block; keep that inside the default scoped
    # VMEM limit (16 MiB on v5e, 32 MiB on v6e/v7x).
    max_block_bytes = (4 << 20) if ("v6" in kind or "v7" in kind) else (3 << 20)

    # Lane tile: multiple of 128 (unmasked vst on 128-aligned widths; at most
    # one ragged column block otherwise).
    lane_cap = max(128, _round_down(max_block_bytes // (8 * itemsize), 128))
    hw_tile = min(_round_up(hw, 128), lane_cap)

    # Sublane tile: multiple of 8, filling the remaining block budget.
    row_cap = max(8, _round_down(max_block_bytes // (hw_tile * itemsize), 8))
    row_tile = min(_round_up(rows, 8), row_cap)

    # Keep both TensorCores busy on v7x: for large inputs make sure the grid
    # has >= ~4 steps, but never shrink a block below ~512 KiB.
    min_block_bytes = 512 * 1024
    while _cdiv(rows, row_tile) * _cdiv(hw, hw_tile) < 4:
        if (row_tile * hw_tile * itemsize) // 2 < min_block_bytes:
            break
        if row_tile >= 16:
            row_tile = max(8, _round_down(row_tile // 2, 8))
        elif hw_tile >= 256:
            hw_tile = max(128, _round_down(hw_tile // 2, 128))
        else:
            break

    grid = (_cdiv(rows, row_tile), _cdiv(hw, hw_tile))
    # --------------------------------------------------------------------

    out2 = pl.pallas_call(
        _normalize_kernel,
        out_shape=jax.ShapeDtypeStruct((rows, hw), x.dtype),
        grid_spec=pltpu.PrefetchScalarGridSpec(
            num_scalar_prefetch=0,
            grid=grid,
            in_specs=[
                # packed [scale | bias]; only re-fetched when i changes (j is inner)
                pl.BlockSpec((row_tile, 2), lambda i, j: (i, 0)),
                pl.BlockSpec((row_tile, hw_tile), lambda i, j: (i, j)),
            ],
            out_specs=pl.BlockSpec((row_tile, hw_tile), lambda i, j: (i, j)),
        ),
        compiler_params=pltpu.CompilerParams(
            dimension_semantics=("parallel", "parallel"),
        ),
    )(sb, x2)

    return out2.reshape(n, c, h, w)


if __name__ == "__main__":
    key = jax.random.PRNGKey(0)

    # Small NCHW input consistent with the module (batch=2, channels=4, 16x16).
    N, C, H, W = 2, 4, 16, 16
    x = jax.random.normal(key, (N, C, H, W), dtype=jnp.float32)

    # Deterministic "dataset statistics" (CIFAR-like per-channel values).
    means = jnp.array([0.4914, 0.4822, 0.4465, 0.5000], dtype=jnp.float32)
    sds = jnp.array([0.2023, 0.1994, 0.2010, 0.2500], dtype=jnp.float32)

    out = jax.block_until_ready(normalize_layer(x, means, sds))

    # Reference check (plain JAX broadcasting, same semantics as the torch module).
    ref = (x - means[None, :, None, None]) / sds[None, :, None, None]
    assert out.shape == x.shape and out.dtype == x.dtype
    assert jnp.allclose(out, ref, atol=1e-5, rtol=1e-5)

    print("KERNEL_OK")
</pallas_src>

<mosaic_0001>
module attributes {stable_mosaic.version = 11 : i64} {
  func.func @_normalize_kernel(%arg0: i32, %arg1: i32, %arg2: memref<8x2xf32, #tpu.memory_space<vmem>>, %arg3: memref<8x256xf32, #tpu.memory_space<vmem>>, %arg4: memref<8x256xf32, #tpu.memory_space<vmem>>) attributes {dimension_semantics = [#tpu.dimension_semantics<parallel>, #tpu.dimension_semantics<parallel>], iteration_bounds = array<i64: 1, 1>, scalar_prefetch = 0 : i64, scratch_operands = 0 : i64, tpu.core_type = #tpu.core_type<tc>, window_params = [{transform_indices = @transform_0, window_bounds = array<i64: 8, 2>}, {transform_indices = @transform_1, window_bounds = array<i64: 8, 256>}, {transform_indices = @transform_2, window_bounds = array<i64: 8, 256>}]} {
    %c0 = arith.constant 0 : index
    %c0_0 = arith.constant 0 : index
    %0 = vector.load %arg2[%c0, %c0_0] : memref<8x2xf32, #tpu.memory_space<vmem>>, vector<8x2xf32>
    %1 = vector.extract_strided_slice %0 {offsets = [0, 0], sizes = [8, 1], strides = [1, 1]} : vector<8x2xf32> to vector<8x1xf32>
    %2 = vector.extract_strided_slice %0 {offsets = [0, 1], sizes = [8, 1], strides = [1, 1]} : vector<8x2xf32> to vector<8x1xf32>
    %c0_1 = arith.constant 0 : index
    %c0_2 = arith.constant 0 : index
    %3 = vector.load %arg3[%c0_1, %c0_2] : memref<8x256xf32, #tpu.memory_space<vmem>>, vector<8x256xf32>
    %4 = vector.broadcast %1 : vector<8x1xf32> to vector<8x256xf32>
    %5 = arith.mulf %3, %4 : vector<8x256xf32>
    %6 = vector.broadcast %2 : vector<8x1xf32> to vector<8x256xf32>
    %7 = arith.addf %5, %6 : vector<8x256xf32>
    %c0_3 = arith.constant 0 : index
    %c0_4 = arith.constant 0 : index
    %8 = vector.load %arg4[%c0_3, %c0_4] : memref<8x256xf32, #tpu.memory_space<vmem>>, vector<8x256xf32>
    tpu.vector_store %arg4[%c0_3, %c0_4], %7 {strides = array<i32>} : memref<8x256xf32, #tpu.memory_space<vmem>>, vector<8x256xf32>,
    return
  }
  func.func @transform_0(%arg0: i32, %arg1: i32) -> (i32, i32) {
    %c0_i32 = arith.constant 0 : i32
    %c0_i32_0 = arith.constant 0 : i32
    return %arg0, %c0_i32 : i32, i32
  }
  func.func @transform_1(%arg0: i32, %arg1: i32) -> (i32, i32) {
    %c0_i32 = arith.constant 0 : i32
    return %arg0, %arg1 : i32, i32
  }
  func.func @transform_2(%arg0: i32, %arg1: i32) -> (i32, i32) {
    %c0_i32 = arith.constant 0 : i32
    return %arg0, %arg1 : i32, i32
  }
}

</mosaic_0001>

<bundles_post_ra>
// kernel: tpu_custom_call.1
= control target key start
LH: loop header
LB: loop body
LE: loop exit
PB: predicated region body
PF: predicated region fallthrough
CT: control target
= control target key end

     0   :  { %7 = vsyncpa [#allocation3], 0  ;;  %s135_s0 = inlined_call_operand.vmem [shape: f32[8,2], index: 0, kind: input, shape index: {}]   ;;  %s136_s1 = inlined_call_operand.hbm [shape: f32[8,256], index: 1, kind: input, shape index: {}]   ;;  %s137_s2 = inlined_call_operand.hbm [shape: f32[8,256], index: 2, kind: output, shape index: {}]  }
   0x1   :  { %8 = vsyncpa [#allocation4], 0  ;;  %s107_s9 = smov [#allocation2]  }
   0x2   :  { %s17_s10 = sshll.u32 %s107_s9, 4  ;;  %s18_s10 = int_to_ptr.vmem [resolvable:$true] %s17_s10 }
   0x3   :  { %s71_s11 = scalar_lea.vmem %s18_s10, 256  ;;  %p76_p1 = scmp.lt.s32.totalorder %s18_s10, %s18_s10 }
   0x4   :  { %p72_p0 = scmp.ne.s32.totalorder %s18_s10, %s71_s11  ;;  %p77_p2 = scmp.lt.s32.totalorder %s71_s11, %s71_s11 }
   0x6   :  { %p78_p3 = por %p77_p2, %p76_p1 }
   0x8   :  { %p79_p4 = pnand %p78_p3, %p72_p0 }
   0xa   :  { %82 = shalt.err (!%p79_p4)
}
   0xb   :  { %20 = dma.hbm_to_vmem [thread:$0]  %s136_s1, 256, %s18_s10, [#allocation3]  }
   0xc   :  { %103 = dma.done.wait [#allocation3], 256  }
   0xd   :  { %104 = vsyncadd [#allocation3], 4294967040  ;;  %v108_v0 = vmov 0   ;;  %v24_v1 = vld [vmem:[%s135_s0] sm:$0xff]  ;;  %v109_v2 = vmov 1   ;;  %v26_v5 = vld [vmem:[#allocation2 + $0x8] sm:$0xff] }
   0xe   :  { %61 = vset.pattern.permute.xlu0 %v108_v0  ;;  %v25_v4 = vld [vmem:[#allocation2] sm:$0xff]  ;;  %s110_s16 = smov [#allocation5]  }
   0xf   :  { %29 = vperm.xlu0 %61, %v24_v1   ;;  %s48_s17 = sshll.u32 %s110_s16, 4  ;;  %s49_s17 = int_to_ptr.vmem [resolvable:$true] %s48_s17 }
  0x10   :  { %s83_s1 = scalar_lea.vmem %s49_s17, 256  ;;  %p88_p6 = scmp.lt.s32.totalorder %s49_s17, %s49_s17 }
  0x11   :  { %p84_p5 = scmp.ne.s32.totalorder %s49_s17, %s83_s1  ;;  %p89_p7 = scmp.lt.s32.totalorder %s83_s1, %s83_s1 }
  0x13   :  { %62 = vset.pattern.permute.xlu0 %v109_v2  ;;  %p90_p8 = por %p89_p7, %p88_p6 }
  0x14   :  { %35 = vperm.xlu0 %62, %v24_v1  }
  0x15   :  { %p91_p9 = pnand %p90_p8, %p84_p5 }
  0x8a   :  { %v30_v3 = vpop.permute.xlu0 %29 }
  0x8b   :  { %v32_v6 = vmul.f32 %v30_v3, %v25_v4  ;;  %v33_v7 = vmul.f32 %v30_v3, %v26_v5 }
  0x8f   :  { %v36_v8 = vpop.permute.xlu0 %35 }
  0x90   :  { %v38_v9 = vadd.f32 %v36_v8, %v32_v6  ;;  %v39_v10 = vadd.f32 %v36_v8, %v33_v7 }
  0x92   :  { %40 = vst [vmem:[#allocation5] sm:$0xff] %v38_v9  ;;  %41 = vst [vmem:[#allocation5 + $0x8] sm:$0xff] %v39_v10 }
  0x93   :  { %94 = shalt.err (!%p91_p9)
}
  0x94   :  { %51 = dma.vmem_to_hbm [thread:$0]  %s49_s17, 256, %s137_s2, [#allocation4]  }
  0x95   :  { %105 = dma.done.wait [#allocation4], 256  }
  0x96   :  { %106 = vsyncadd [#allocation4], 4294967040 }
  0x97   :  { %55 = vsyncpa [#allocation3], 1 }
  0x98   :  { %56 = vsyncpa [#allocation4], 1 }

</bundles_post_ra>
